<compile_context>
chip_gen: v6e
topology: v6e:2x2x1
jax: 0.10.0
libtpu: 0.0.40
codegen_flags: <defaults>
</compile_context>

<pallas_src>
import functools

import jax
import jax.numpy as jnp
from jax.experimental import pallas as pl
from jax.experimental.pallas import tpu as pltpu


def se_kernel(x_ref, w1_ref, b1_ref, w2_ref, b2_ref, o_ref, *,
              channels_last, scale_in_input_dtype):
    # Block is (Bt, HW, C) if channels_last else (Bt, C, HW).
    reduce_axis = 1 if channels_last else 2

    # Squeeze: global average pool.  The f32 upcast feeds only this reduction
    # (single consumer), so no block-sized f32 temporary is kept live.
    sq = jnp.mean(x_ref[...].astype(jnp.float32), axis=reduce_axis)     # (Bt, C)

    # Excitation: one batched (Bt, C) @ (C, Cr) matmul per grid step.
    # Weights/biases are already f32 (pre-cast in the wrapper, VMEM-resident).
    h = jnp.dot(sq, w1_ref[...], preferred_element_type=jnp.float32) + b1_ref[...]
    h = jnp.maximum(h, 0.0)                                             # (Bt, Cr)
    ex = jnp.dot(h, w2_ref[...], preferred_element_type=jnp.float32) + b2_ref[...]
    ex = jax.nn.sigmoid(ex)                                             # (Bt, C)

    ex_b = ex[:, None, :] if channels_last else ex[:, :, None]

    # Scale: second, independent read of the (already VMEM-resident) block.
    if scale_in_input_dtype:
        # bf16 multiply path: halves the bytes moved through vld/vst on
        # v6e/v7x (bf16 VALU); on v5e the VPU upcasts internally anyway.
        o_ref[...] = x_ref[...] * ex_b.astype(o_ref.dtype)
    else:
        o_ref[...] = (x_ref[...].astype(jnp.float32) * ex_b).astype(o_ref.dtype)


def _vmem_budgets():
    """Generation-aware VMEM budgets: ~85% of capacity for the scoped limit
    (~108 MiB on 128 MiB v5e/v6e, ~54 MiB on 64 MiB-per-TC v7x), and 80% of
    that for the double-buffered block budget (headroom for weights/temps)."""
    cap = 64 << 20  # conservative fallback = v7x per-TC VMEM
    try:
        cap = int(getattr(pltpu.get_tpu_info(), "vmem_capacity_bytes", cap))
    except Exception:
        pass
    vmem_limit = int(cap * 0.85)
    block_budget = int(vmem_limit * 0.80)
    return block_budget, vmem_limit


def _choose_batch_tile(B, C, HW, itemsize, block_budget, min_steps=4):
    """Largest divisor Bt of B whose double-buffered input + output blocks
    (4 * Bt * C * HW * itemsize) fit the budget, while keeping at least
    min(min_steps, B) grid steps so that under the ("parallel",) megacore
    split each v7x TensorCore gets >= 2 steps (per-core double-buffering).
    Returns None if even a single batch row does not fit."""
    per_row = C * HW * itemsize
    if 4 * per_row > block_budget:
        return None
    need_steps = min(min_steps, B)
    best = 1
    for bt in range(1, B + 1):
        if B % bt:
            continue
        if B // bt < need_steps:
            continue
        if 4 * bt * per_row <= block_budget:
            best = max(best, bt)
    return best


def se_wrapper(x_nchw, w1, b1, w2, b2):
    """x_nchw: (B, C, H, W); w1: (C, Cr); b1: (1, Cr); w2: (Cr, C); b2: (1, C).
    Weights are (in, out) so the kernel computes y = x @ W + b.  Activations
    may be f32 or bf16 (f32 squeeze/MLP either way)."""
    B, C, H, W = x_nchw.shape
    HW = H * W
    Cr = w1.shape[1]
    in_dtype = x_nchw.dtype
    itemsize = jnp.dtype(in_dtype).itemsize

    # Pre-cast the tiny, VMEM-resident parameters to f32 once (outside the
    # kernel) so there is no per-grid-step upcast work.
    w1f = w1.astype(jnp.float32)
    b1f = b1.astype(jnp.float32)
    w2f = w2.astype(jnp.float32)
    b2f = b2.astype(jnp.float32)

    # Layout: present a lane-dense last axis to avoid masked vst.msk stores.
    channels_last = (HW % 128 != 0) and (C % 128 == 0)
    if channels_last:
        x = x_nchw.transpose(0, 2, 3, 1).reshape(B, HW, C)   # (B, HW, C)
        block_shape = lambda bt: (bt, HW, C)
    else:
        x = x_nchw.reshape(B, C, HW)                         # (B, C, HW)
        block_shape = lambda bt: (bt, C, HW)

    block_budget, vmem_limit = _vmem_budgets()
    Bt = _choose_batch_tile(B, C, HW, itemsize, block_budget)
    if Bt is None:
        # TODO(synk): two-phase HW-tiled path (accumulate sq over an
        # "arbitrary" spatial grid axis into scratch, then re-read x to apply
        # the gate) for maps where one batch row exceeds the VMEM budget.
        raise ValueError(
            f"One batch row (C={C}, HW={HW}, {itemsize}B/elem) does not fit "
            f"the VMEM block budget ({block_budget} bytes); spatial chunking "
            "is not implemented.")
    grid = (B // Bt,)

    # bf16 rescale multiply only when the streamed dtype is bf16.
    scale_in_input_dtype = (in_dtype == jnp.bfloat16)

    kernel = functools.partial(
        se_kernel,
        channels_last=channels_last,
        scale_in_input_dtype=scale_in_input_dtype,
    )

    cost = pl.CostEstimate(
        flops=int(4 * B * C * Cr + 2 * B * C * HW),
        transcendentals=int(B * C),
        bytes_accessed=int(2 * B * C * HW * itemsize
                           + (C * Cr + Cr * C + Cr + C) * 4),
    )

    out = pl.pallas_call(
        kernel,
        out_shape=jax.ShapeDtypeStruct(x.shape, in_dtype),
        grid_spec=pltpu.PrefetchScalarGridSpec(
            num_scalar_prefetch=0,
            grid=grid,
            in_specs=[
                pl.BlockSpec(block_shape(Bt), lambda b: (b, 0, 0)),
                pl.BlockSpec((C, Cr), lambda b: (0, 0)),   # constant index ->
                pl.BlockSpec((1, Cr), lambda b: (0, 0)),   # weights stay
                pl.BlockSpec((Cr, C), lambda b: (0, 0)),   # resident in VMEM
                pl.BlockSpec((1, C), lambda b: (0, 0)),    # across grid steps
            ],
            out_specs=pl.BlockSpec(block_shape(Bt), lambda b: (b, 0, 0)),
        ),
        compiler_params=pltpu.CompilerParams(
            dimension_semantics=("parallel",),
            vmem_limit_bytes=vmem_limit,
        ),
        cost_estimate=cost,
    )(x, w1f, b1f, w2f, b2f)

    if channels_last:
        return out.reshape(B, H, W, C).transpose(0, 3, 1, 2)
    return out.reshape(B, C, H, W)


def se_reference(x_nchw, w1, b1, w2, b2):
    sq = x_nchw.astype(jnp.float32).mean(axis=(-1, -2))            # (B, C)
    h = jnp.maximum(sq @ w1.astype(jnp.float32) + b1.astype(jnp.float32), 0.0)
    ex = jax.nn.sigmoid(h @ w2.astype(jnp.float32) + b2.astype(jnp.float32))
    return (x_nchw.astype(jnp.float32) * ex[:, :, None, None]).astype(x_nchw.dtype)


if __name__ == "__main__":
    # Small shapes consistent with the module: batch=2, channels=8, ratio=4,
    # spatial=16x16.
    B, C, H, W = 2, 8, 16, 16
    ratio = 4
    Cr = C // ratio

    key = jax.random.PRNGKey(0)
    kx, k1, k2, k3, k4 = jax.random.split(key, 5)

    x = jax.random.normal(kx, (B, C, H, W), dtype=jnp.float32)
    # Deterministic nn.Linear-style init, stored as (in, out) so the kernel
    # computes y = x @ W + b.
    w1 = jax.random.uniform(k1, (C, Cr), jnp.float32, -1.0, 1.0) / jnp.sqrt(C)
    b1 = jax.random.uniform(k2, (1, Cr), jnp.float32, -1.0, 1.0) / jnp.sqrt(C)
    w2 = jax.random.uniform(k3, (Cr, C), jnp.float32, -1.0, 1.0) / jnp.sqrt(Cr)
    b2 = jax.random.uniform(k4, (1, C), jnp.float32, -1.0, 1.0) / jnp.sqrt(Cr)

    out = jax.block_until_ready(se_wrapper(x, w1, b1, w2, b2))
    ref = jax.block_until_ready(se_reference(x, w1, b1, w2, b2))

    assert out.shape == (B, C, H, W)
    assert jnp.allclose(out, ref, atol=1e-5, rtol=1e-5), "mismatch vs reference"
    print("KERNEL_OK")
</pallas_src>

<mosaic_0001>
module attributes {stable_mosaic.version = 11 : i64} {
  func.func @se_kernel(%arg0: i32, %arg1: memref<1x8x256xf32, #tpu.memory_space<vmem>>, %arg2: memref<8x2xf32, #tpu.memory_space<vmem>>, %arg3: memref<1x2xf32, #tpu.memory_space<vmem>>, %arg4: memref<2x8xf32, #tpu.memory_space<vmem>>, %arg5: memref<1x8xf32, #tpu.memory_space<vmem>>, %arg6: memref<1x8x256xf32, #tpu.memory_space<vmem>>) attributes {dimension_semantics = [#tpu.dimension_semantics<parallel>], iteration_bounds = array<i64: 2>, scalar_prefetch = 0 : i64, scratch_operands = 0 : i64, tpu.core_type = #tpu.core_type<tc>, window_params = [{transform_indices = @transform_0, window_bounds = array<i64: 1, 8, 256>}, {pipeline_mode = #tpu.pipeline_mode<synchronous>, transform_indices = @transform_1, window_bounds = array<i64: 8, 2>}, {pipeline_mode = #tpu.pipeline_mode<synchronous>, transform_indices = @transform_2, window_bounds = array<i64: 1, 2>}, {pipeline_mode = #tpu.pipeline_mode<synchronous>, transform_indices = @transform_3, window_bounds = array<i64: 2, 8>}, {pipeline_mode = #tpu.pipeline_mode<synchronous>, transform_indices = @transform_4, window_bounds = array<i64: 1, 8>}, {transform_indices = @transform_5, window_bounds = array<i64: 1, 8, 256>}]} {
    %c0 = arith.constant 0 : index
    %c0_0 = arith.constant 0 : index
    %c0_1 = arith.constant 0 : index
    %0 = vector.load %arg1[%c0, %c0_0, %c0_1] : memref<1x8x256xf32, #tpu.memory_space<vmem>>, vector<1x8x256xf32>
    %cst = arith.constant dense<0.000000e+00> : vector<1x8xf32>
    %1 = vector.multi_reduction <add>, %0, %cst [2] : vector<1x8x256xf32> to vector<1x8xf32>
    %cst_2 = arith.constant 2.560000e+02 : f32
    %2 = vector.broadcast %cst_2 : f32 to vector<1x8xf32>
    %3 = arith.divf %1, %2 : vector<1x8xf32>
    %c0_3 = arith.constant 0 : index
    %c0_4 = arith.constant 0 : index
    %4 = vector.load %arg2[%c0_3, %c0_4] : memref<8x2xf32, #tpu.memory_space<vmem>>, vector<8x2xf32>
    %cst_5 = arith.constant dense<0.000000e+00> : vector<1x2xf32>
    %5 = tpu.matmul %3, %4, %cst_5 {dimension_numbers = #tpu.dot_dimension_numbers<[1], [0], [0], [1], [0, 0, 1, 1], [], []>} : vector<1x8xf32>, vector<8x2xf32>, vector<1x2xf32> -> vector<1x2xf32>
    %c0_6 = arith.constant 0 : index
    %c0_7 = arith.constant 0 : index
    %6 = vector.load %arg3[%c0_6, %c0_7] : memref<1x2xf32, #tpu.memory_space<vmem>>, vector<1x2xf32>
    %7 = arith.addf %5, %6 : vector<1x2xf32>
    %cst_8 = arith.constant 0.000000e+00 : f32
    %8 = vector.broadcast %cst_8 : f32 to vector<1x2xf32>
    %9 = arith.maximumf %7, %8 : vector<1x2xf32>
    %c0_9 = arith.constant 0 : index
    %c0_10 = arith.constant 0 : index
    %10 = vector.load %arg4[%c0_9, %c0_10] : memref<2x8xf32, #tpu.memory_space<vmem>>, vector<2x8xf32>
    %cst_11 = arith.constant dense<0.000000e+00> : vector<1x8xf32>
    %11 = tpu.matmul %9, %10, %cst_11 {dimension_numbers = #tpu.dot_dimension_numbers<[1], [0], [0], [1], [0, 0, 1, 1], [], []>} : vector<1x2xf32>, vector<2x8xf32>, vector<1x8xf32> -> vector<1x8xf32>
    %c0_12 = arith.constant 0 : index
    %c0_13 = arith.constant 0 : index
    %12 = vector.load %arg5[%c0_12, %c0_13] : memref<1x8xf32, #tpu.memory_space<vmem>>, vector<1x8xf32>
    %13 = arith.addf %11, %12 : vector<1x8xf32>
    %14 = arith.negf %13 : vector<1x8xf32>
    %15 = math.exp %14 : vector<1x8xf32>
    %cst_14 = arith.constant 1.000000e+00 : f32
    %16 = vector.broadcast %cst_14 : f32 to vector<1x8xf32>
    %17 = arith.addf %16, %15 : vector<1x8xf32>
    %18 = arith.divf %16, %17 : vector<1x8xf32>
    %19 = vector.shape_cast %18 : vector<1x8xf32> to vector<1x8x1xf32>
    %c0_15 = arith.constant 0 : index
    %c0_16 = arith.constant 0 : index
    %c0_17 = arith.constant 0 : index
    %20 = vector.load %arg1[%c0_15, %c0_16, %c0_17] : memref<1x8x256xf32, #tpu.memory_space<vmem>>, vector<1x8x256xf32>
    %21 = vector.broadcast %19 : vector<1x8x1xf32> to vector<1x8x256xf32>
    %22 = arith.mulf %20, %21 : vector<1x8x256xf32>
    %c0_18 = arith.constant 0 : index
    %c0_19 = arith.constant 0 : index
    %c0_20 = arith.constant 0 : index
    %23 = vector.load %arg6[%c0_18, %c0_19, %c0_20] : memref<1x8x256xf32, #tpu.memory_space<vmem>>, vector<1x8x256xf32>
    tpu.vector_store %arg6[%c0_18, %c0_19, %c0_20], %22 {strides = array<i32>} : memref<1x8x256xf32, #tpu.memory_space<vmem>>, vector<1x8x256xf32>,
    return
  }
  func.func @transform_0(%arg0: i32) -> (i32, i32, i32) {
    %c0_i32 = arith.constant 0 : i32
    %c0_i32_0 = arith.constant 0 : i32
    %c0_i32_1 = arith.constant 0 : i32
    return %arg0, %c0_i32, %c0_i32_0 : i32, i32, i32
  }
  func.func @transform_1(%arg0: i32) -> (i32, i32) {
    %c0_i32 = arith.constant 0 : i32
    %c0_i32_0 = arith.constant 0 : i32
    %c0_i32_1 = arith.constant 0 : i32
    return %c0_i32, %c0_i32_0 : i32, i32
  }
  func.func @transform_2(%arg0: i32) -> (i32, i32) {
    %c0_i32 = arith.constant 0 : i32
    %c0_i32_0 = arith.constant 0 : i32
    %c0_i32_1 = arith.constant 0 : i32
    return %c0_i32, %c0_i32_0 : i32, i32
  }
  func.func @transform_3(%arg0: i32) -> (i32, i32) {
    %c0_i32 = arith.constant 0 : i32
    %c0_i32_0 = arith.constant 0 : i32
    %c0_i32_1 = arith.constant 0 : i32
    return %c0_i32, %c0_i32_0 : i32, i32
  }
  func.func @transform_4(%arg0: i32) -> (i32, i32) {
    %c0_i32 = arith.constant 0 : i32
    %c0_i32_0 = arith.constant 0 : i32
    %c0_i32_1 = arith.constant 0 : i32
    return %c0_i32, %c0_i32_0 : i32, i32
  }
  func.func @transform_5(%arg0: i32) -> (i32, i32, i32) {
    %c0_i32 = arith.constant 0 : i32
    %c0_i32_0 = arith.constant 0 : i32
    %c0_i32_1 = arith.constant 0 : i32
    return %arg0, %c0_i32, %c0_i32_0 : i32, i32, i32
  }
}

</mosaic_0001>

<bundles_post_ra>
// kernel: tpu_custom_call.1
= control target key start
LH: loop header
LB: loop body
LE: loop exit
PB: predicated region body
PF: predicated region fallthrough
CT: control target
= control target key end

     0   :  { %10 = vsyncpa [#allocation3], 0  ;;  %s890_s0 = inlined_call_operand.hbm [shape: f32[2,8,256], index: 0, kind: input, shape index: {}]   ;;  %s891_s1 = inlined_call_operand.vmem [shape: f32[8,2], index: 1, kind: input, shape index: {}]   ;;  %s892_s2 = inlined_call_operand.vmem [shape: f32[1,2], index: 2, kind: input, shape index: {}]   ;;  %s893_s3 = inlined_call_operand.vmem [shape: f32[2,8], index: 3, kind: input, shape index: {}]   ;;  %s894_s4 = inlined_call_operand.vmem [shape: f32[1,8], index: 4, kind: input, shape index: {}]   ;;  %s895_s5 = inlined_call_operand.hbm [shape: f32[2,8,256], index: 5, kind: output, shape index: {}]  }
   0x1   :  { %12 = vsyncpa [#allocation3 + $0x1], 0 }
   0x2   :  { %13 = vsyncpa [#allocation4], 0 }
   0x3   :  { %15 = vsyncpa [#allocation4 + $0x1], 0  ;;  %s727_s18 = smov 0   ;;  %s729_s19 = smov 0  }
   0x4   :  { %s731_s20 = smov 0   ;;  %s733_s21 = smov 0  }
   0x5 LB: > { %s748_s22 = sadd.s32 4294967295, %s691_s21   ;;  %s513_s23 = sadd.s32 4294967294, %s691_s21   ;;  %s691_s21 = sphi %s733_s21, %s912_s21   ;;  %s687_s20 = sphi %s731_s20, %s911_s20   ;;  %s683_s19 = sphi %s729_s19, %s910_s19   ;;  %s679_s18 = sphi %s727_s18, %s909_s18  }
   0x6   : > { %s752_s24 = sadd.s32 1, %s691_s21   ;;  %s28_s25 = sadd.s32 1, %s687_s20 }
   0x7   : > { %s25_s26 = ssub.s32 %s691_s21, %s752_s24  ;;  %p35_p0 = scmp.ne.s32.totalorder %s687_s20, %s683_s19 }
   0x8   : > { %p26_p1 = scmp.eq.s32.totalorder %s25_s26, 0  ;;  %p36_p2 = scmp.eq.s32.totalorder %s691_s21, 0 }
   0x9   : > { %p41_p3 = scmp.ne.s32.totalorder %s683_s19, %s679_s18  ;;  %p42_p4 = scmp.eq.s32.totalorder %s748_s22, 0 }
   0xa   : > { %s764_s27 = scalar_select %p26_p1, %s687_s20, %s28_s25  }
   0xb   : > { %p766_p5 = por %p36_p2, %p35_p0  ;;  %p770_p6 = por %p42_p4, %p41_p3 }
   0xc   : > { %p149_p7 = scmp.eq.s32.totalorder %s748_s22, 1  ;;  %p155_p8 = scmp.eq.s32.totalorder %s513_s23, 1 }
   0xd   : > { %s899_s29 = scalar_select %p770_p6, 1, 0 }
   0xe   : > { %p559_p10 = scmp.lt.s32.totalorder %s691_s21, 2  ;;  %p777_p11 = por %p149_p7, %p35_p0 }
   0xf   : > { %p781_p12 = por %p155_p8, %p41_p3  ;;  %s187_s7 = sand.u32 1, %s687_s20  }
  0x10   : > { %s900_s30 = scalar_select %p777_p11, 1, 0 }
  0x11   : > { %s901_s6 = scalar_select %p781_p12, 1, 0 }
  0x12   : > { %s531_s8 = sshll.u32 %s691_s21, 8  ;;  %s516_s9 = sshll.u32 %s187_s7, 4 }
  0x13   : > { %s790_s12 = scalar_lea.hbm %s890_s0, %s531_s8  ;;  %s191_s13 = scalar_lea.vmem [#allocation2], %s516_s9 }
  0x14   : > { %s199_s14 = sshll.u32 %s191_s13, 4  ;;  %p794_p13 = pnand %p559_p10, %p766_p5  ;;  %s798_s14 = int_to_ptr.vmem [resolvable:$true] %s199_s14 }
  0x15   : > { %s188_s16 = scalar_lea.sflag [#allocation3], %s187_s7  ;;  %s599_s17 = scalar_lea.hbm %s790_s12, 256 }
  0x16   : > { %p600_p2 = scmp.ne.s32.totalorder %s790_s12, %s599_s17  ;;  %p601_p3 = pneg %p794_p13 }
  0x17   : > { %s604_s26 = scalar_lea.hbm %s890_s0, 512  ;;  %p605_p5 = scmp.lt.s32.totalorder %s790_s12, %s890_s0 }
  0x18   : > { %p602_p4 = pnand %p601_p3, %p600_p2  ;;  %p606_p8 = scmp.lt.s32.totalorder %s604_s26, %s599_s17 }
  0x1a   : > { %p603_p7 = pneg %p602_p4  ;;  %p607_p10 = por %p606_p8, %p605_p5 }
  0x1c   : > { %p608_p9 = pnand %p607_p10, %p603_p7 }
  0x1e   : > { %611 = shalt.err (!%p608_p9)
}
  0x1f   : > { %s612_s7 = scalar_lea.vmem %s798_s14, 256  ;;  %s693_s9 = smov [#allocation2]  }
  0x20   : > { %p613_p0 = scmp.ne.s32.totalorder %s798_s14, %s612_s7  ;;  %s617_s10 = sshll.u32 %s693_s9, 4  ;;  %s618_s10 = int_to_ptr.vmem [resolvable:$false] %s617_s10 }
  0x21   : > { %s619_s11 = scalar_lea.vmem %s618_s10, 512  ;;  %p620_p4 = scmp.lt.s32.totalorder %s798_s14, %s618_s10 }
  0x22   : > { %p615_p1 = pnand %p613_p0, %p601_p3  ;;  %p621_p12 = scmp.lt.s32.totalorder %s619_s11, %s612_s7 }
  0x24   : > { %p616_p2 = pneg %p615_p1  ;;  %p622_p11 = por %p621_p12, %p620_p4 }
  0x26   : > { %p623_p6 = pnand %p622_p11, %p616_p2 }
  0x28   : > { %626 = shalt.err (!%p623_p6)
}
  0x29   : > { %554 = dma.hbm_to_vmem [thread:$0]  (!%p794_p13), %s790_s12, 256, %s798_s14, %s188_s16  }
  0x2a   : > { %p903_p9 = scmp.lt.s32.totalorder %s691_s21, 3  ;;  %p904_p7 = scmp.ge.s32.totalorder %s691_s21, 1 }
  0x2c   : > { %p205_p0 = pnand %p904_p7, %p903_p9 }
  0x2d   : > { %s825_s13 = sand.u32 (!%p205_p0), 1, %s683_s19   ;;  %p905_p6 = scmp.ne.s32.totalorder (!%p205_p0), %s899_s29, 0 }
  0x2e   : > { %208 = sbr.rel (%p205_p0) target bundleno = 753 (0x2f1), region = 40  ;;  %s520_s17 = sshll.u32 (!%p205_p0), %s825_s13, 4 }
  0x2f   : > { %s211_s23 = scalar_lea.sflag (!%p205_p0), [#allocation3], %s825_s13  ;;  %s214_s15 = scalar_lea.vmem (!%p205_p0), [#allocation2], %s520_s17 }
  0x33   : > { %670 = dma.done.wait (%p905_p6), %s211_s23, 256  }
  0x34   : > { %672 = vsyncadd (%p905_p6), %s211_s23, 4294967040  ;;  %v241_v0 = vld [vmem:[%s214_s15] sm:$0xff]  ;;  %v242_v1 = vld [vmem:[%s214_s15 + $0x8] sm:$0xff]  ;;  %v694_v3 = vmov 0.0   ;;  %vm695_vm0 = vmmov 0   ;;  %v251_v5 = vlaneseq  ;;  %vm257_vm1 = vcmask 64512  }
  0x35   : > { %v243_v2 = vadd.f32 %v242_v1, %v241_v0  ;;  %537 = vmatprep.subr.mxu0 %v694_v3  ;;  %v248_v4 = vld [vmem:[%s891_s1] sm:$0xff]  ;;  %542 = vmatprep.subr.mxu1 %v694_v3  ;;  %vm337_vm2 = vcmask 1041408   ;;  %vm333_vm3 = vcmask 15360   ;;  %s532_s7 = sshll.u32 %s748_s22, 8  ;;  %s240_s9 = scalar_lea.vmem [#allocation5], %s520_s17 }
  0x36   : > { %538 = vmatpush3.msra.mxu0 %v248_v4  ;;  %539 = vmatprep.mubr.msk.f32.mxu0 %vm695_vm0, %v694_v3  ;;  %v252_v6 = vand.u32 127, %v251_v5  ;;  %v254_v7 = vshrl.u32 %v251_v5, 7  ;;  %v331_v12 = vld [vmem:[%s893_s3] sm:$0x3]  ;;  %s443_s10 = sshll.u32 %s240_s9, 4  ;;  %s853_s15 = scalar_lea.hbm %s895_s5, %s532_s7  ;;  %s444_s10 = int_to_ptr.vmem [resolvable:$true] %s443_s10 }
  0x37   : > { %244 = vadd.xlane.f32.xlu0 %v243_v2  ;;  %544 = vmatprep.mubr.msk.f32.mxu1 %vm695_vm0, %v694_v3  ;;  %v249_v13 = vld [vmem:[%s892_s2] sm:$0x1]  ;;  %s429_s12 = scalar_lea.sflag [#allocation4], %s825_s13  ;;  %s627_s14 = scalar_lea.vmem %s444_s10, 256 }
  0x38   : > { %v255_v8 = vsub.s32 %v252_v6, %v254_v7  ;;  %543 = vmatpush3.msk.msra.mxu1 %vm337_vm2, %v331_v12  ;;  %v332_v18 = vld [vmem:[%s894_s4] sm:$0x1]  ;;  %v419_v25 = vsub.s32 0, %v254_v7  ;;  %p628_p11 = scmp.ne.s32.totalorder %s444_s10, %s627_s14  ;;  %p906_p12 = scmp.ne.s32.totalorder %s900_s30, 0 }
  0x39   : > { %s696_s22 = smov [#allocation5]  }
  0x3a   : > { %p629_p13 = pnand %p628_p11, %p906_p12  ;;  %s631_s17 = sshll.u32 %s696_s22, 4  ;;  %s632_s17 = int_to_ptr.vmem [resolvable:$false] %s631_s17 }
  0x3b   : > { %s633_s29 = scalar_lea.vmem %s632_s17, 512  ;;  %p634_p3 = scmp.lt.s32.totalorder %s444_s10, %s632_s17 }
  0x3c   : > { %p630_p1 = pneg %p629_p13  ;;  %p635_p5 = scmp.lt.s32.totalorder %s633_s29, %s627_s14 }
  0x3e   : > { %p636_p8 = por %p635_p5, %p634_p3 }
  0x40   : > { %p637_p10 = pnand %p636_p8, %p630_p1 }
  0xc0   : > { %v245_v9 = vpop.xlane.xlu0 %244 }
  0xc1   : > { %v247_v10 = vmul.f32 0.00390625, %v245_v9 }
  0xc3   : > { %v256_v11 = vrot.slane %v247_v10, %v255_v8 }
  0xc5   : > { %540 = vmatmul.mubr.msk.f32.vlgmr.msra.gmra.mxu0 %vm257_vm1, %v256_v11 }
 0x185   : > { %v326_v14 = vpop.f32.mrf.mxu0 }
 0x186   : > { %v327_v15 = vadd.f32 %v326_v14, %v249_v13 }
 0x187   : > { %v541_v16 = vpop.f32.mrf.mxu0 }
 0x188   : > { %v330_v17 = vmax.f32 %v327_v15, 0.0 }
 0x18a   : > { %545 = vmatmul.mubr.msk.f32.vlgmr.msra.gmra.mxu1 %vm333_vm3, %v330_v17 }
 0x24a   : > { %v407_v19 = vpop.f32.mrf.mxu1 }
 0x24b   : > { %v408_v20 = vadd.f32 %v407_v19, %v332_v18 }
 0x24c   : > { %v546_v21 = vpop.f32.mrf.mxu1 }
 0x24d   : > { %v525_v22 = vmul.f32 -1.442695, %v408_v20 }
 0x24f   : > { %595 = vpow2.f32 %v525_v22 }
 0x25c   : > { %v596_v23 = vpop.eup %595 }
 0x25d   : > { %v414_v24 = vadd.f32 1.0, %v596_v23 }
 0x25f   : > { %597 = vrcp.f32 %v414_v24 }
 0x26c   : > { %v598_v26 = vpop.eup %597 }
 0x26d   : > { %v420_v27 = vrot.slane %v598_v26, %v419_v25 }
 0x26f   : > { %422 = vbcast.lane.b32.xlu0 %v420_v27, 256 }
 0x2e1   : > { %v423_v28 = vpop.permute.xlu0 %422 }
 0x2e2   : > { %v424_v29 = vmul.f32 %v423_v28, %v241_v0  ;;  %v425_v30 = vmul.f32 %v423_v28, %v242_v1 }
 0x2e4   : > { %426 = vst [vmem:[%s240_s9] sm:$0xff] %v424_v29  ;;  %427 = vst [vmem:[%s240_s9 + $0x8] sm:$0xff] %v425_v30 }
 0x2e5   : > { %640 = shalt.err (!%p637_p10)
}
 0x2e6   : > { %s641_s16 = scalar_lea.hbm %s853_s15, 256  ;;  %s645_s26 = scalar_lea.hbm %s895_s5, 512 }
 0x2e7   : > { %p642_p2 = scmp.ne.s32.totalorder %s853_s15, %s641_s16  ;;  %p646_p7 = scmp.lt.s32.totalorder %s853_s15, %s895_s5 }
 0x2e8   : > { %p647_p0 = scmp.lt.s32.totalorder %s645_s26, %s641_s16 }
 0x2e9   : > { %p643_p4 = pnand %p642_p2, %p906_p12 }
 0x2ea   : > { %p648_p6 = por %p647_p0, %p646_p7 }
 0x2eb   : > { %p644_p9 = pneg %p643_p4 }
 0x2ed   : > { %p649_p11 = pnand %p648_p6, %p644_p9 }
 0x2ef   : > { %652 = shalt.err (!%p649_p11)
}
 0x2f0   : > { %549 = dma.vmem_to_hbm [thread:$0]  (%p906_p12), %s444_s10, 256, %s853_s15, %s429_s12  }
 0x2f1 PF: > { %s455_s7 = sand.u32 1, %s679_s18   ;;  %p907_p13 = scmp.ne.s32.totalorder %s901_s6, 0 }
 0x2f2   : > { %p908_p1 = scmp.ge.s32.totalorder %s691_s21, 2  ;;  %s456_s9 = scalar_lea.sflag [#allocation4], %s455_s7 }
 0x2f4   : > { %p556_p3 = pnand %p908_p1, %p907_p13 }
 0x2f6   : > { %p557_p5 = pneg %p556_p3 }
 0x2f8   : > { %674 = dma.done.wait (%p557_p5), %s456_s9, 256  }
 0x2f9   : > { %676 = vsyncadd (%p557_p5), %s456_s9, 4294967040  ;;  %p18_p8 = scmp.ge.s32.totalorder %s752_s24, 4   ;;  %s909_s18 = smov %s683_s19 }
 0x2fa   : > { %s910_s19 = smov %s687_s20  ;;  %s911_s20 = smov %s764_s27 }
 0x2fb   : > { %s912_s21 = smov %s752_s24  ;;  %20 = sbr.rel (!%p18_p8) target bundleno = 5 (0x5), region = 85 }
 0x300   :  { %461 = vsyncpa [#allocation3], 1 }
 0x301   :  { %463 = vsyncpa [#allocation3 + $0x1], 1 }
 0x302   :  { %464 = vsyncpa [#allocation4], 1 }
 0x303   :  { %466 = vsyncpa [#allocation4 + $0x1], 1 }

</bundles_post_ra>
